<compile_context>
chip_gen: v7x
topology: tpu7x:2x2x1
jax: 0.10.0
libtpu: 0.0.40
codegen_flags: <defaults>
</compile_context>

<pallas_src>
import functools

import jax
import jax.numpy as jnp
from jax import lax
from jax.experimental import pallas as pl
from jax.experimental.pallas import tpu as pltpu

LMBDA = 10.0


def _round_up(n, m):
    return ((n + m - 1) // m) * m


def wgan_gp_kernel(alpha_ref, x_ref, gz_ref, w1_ref, b1_ref, w2_ref, out_ref,
                   *, c):
    """Fused: interp -> critic fwd -> analytic input-grad -> per-row penalty."""
    tb, d = x_ref.shape
    l = d // c

    alpha = alpha_ref[...]                                        # (TB, 1) f32
    x = x_ref[...].astype(jnp.float32)                            # bf16 stream -> f32
    gz = gz_ref[...].astype(jnp.float32)
    interp = gz + alpha * (x - gz)                                # (TB, D) f32

    w1 = w1_ref[...]                                              # (H, D) bf16, resident
    # critic forward: h = interp @ W1^T + b1  (NT matmul, bf16 in / f32 acc)
    h = lax.dot_general(
        interp.astype(jnp.bfloat16), w1,
        dimension_numbers=(((1,), (1,)), ((), ())),
        preferred_element_type=jnp.float32) + b1_ref[...]         # (TB, H)
    a = jnp.tanh(h)                                               # (TB, H) f32

    # analytic d(score)/d(interp):  g = ((1 - tanh^2) * w2) @ W1
    s = (1.0 - a * a) * w2_ref[...]                               # (TB, H) f32
    g = jnp.dot(s.astype(jnp.bfloat16), w1,
                preferred_element_type=jnp.float32)               # (TB, D) f32

    # ||g||_2 over the channel dim on the flat layout: channel ci occupies
    # lanes [ci*L, (ci+1)*L) -> C static slice-adds, no cross-lane reduce.
    # TODO(synk): if L % 128 != 0 these slices are not vreg-lane aligned and
    #             Mosaic may insert relayouts; pad L to a lane multiple at scale.
    sq = g * g
    ss = sq[:, 0:l]
    for ci in range(1, c):
        ss = ss + sq[:, ci * l:(ci + 1) * l]                      # (TB, L)

    # Per-row penalty written as a per-tile partial; mean over valid rows,
    # padded-row masking and the lmbda scale happen in the tiny wrapper reduce.
    out_ref[...] = (jnp.sqrt(ss) - 1.0) ** 2                      # (TB, L)


def wgan_gp(x, gz, alpha, w1, b1, w2, lmbda=LMBDA):
    """WGANGP.forward for inputs x, Gz of shape (B, C, L) and the fixed critic
    d(z) = tanh(z_flat @ W1^T + b1) @ w2.  `alpha` plays the role of
    torch.rand(bs, 1, 1) (passed in for determinism)."""
    B, C, L = x.shape
    D = C * L
    H = w1.shape[0]                      # w1: (H, D), b1: (H,), w2: (H,)

    # Pad batch to a sublane/tile multiple; padded rows are dropped in the
    # wrapper-side reduction (slice), so no in-kernel mask is needed.
    B8 = _round_up(B, 8)
    TB = min(B8, 128)                    # batch tile; 256 worth trying on v6e (128 MiB VMEM)
    B_pad = _round_up(B8, TB)
    n_tiles = B_pad // TB

    def pad_rows(z, dtype):
        return jnp.pad(z.astype(dtype), ((0, B_pad - B), (0, 0)))

    # bf16 streaming of the only per-tile HBM tensors: halves DMA + buffer VMEM.
    x_f = pad_rows(x.reshape(B, D), jnp.bfloat16)
    gz_f = pad_rows(gz.reshape(B, D), jnp.bfloat16)
    alpha2 = pad_rows(alpha.reshape(B, 1), jnp.float32)
    w1_bf = jnp.asarray(w1, jnp.bfloat16)             # single resident (H, D) copy
    b1r = jnp.asarray(b1, jnp.float32).reshape(1, H)
    w2r = jnp.asarray(w2, jnp.float32).reshape(1, H)

    # Scoped-VMEM budget: streamed inputs (double-buffered) + resident weight,
    # with 2x headroom, floored at 16 MiB and capped inside v7x's 64 MiB VMEM.
    needed = (2 * 2 * TB * D * 2          # x, gz (bf16, 2 buffers each)
              + 2 * TB * 4                # alpha (f32, 2 buffers)
              + 2 * H * D * 2             # W1 (budgeted at 2 buffers for safety)
              + 2 * 2 * H * 4             # b1, w2
              + 2 * TB * L * 4)           # output tile
    vmem_limit = int(min(60 * (1 << 20), max(2 * needed + (4 << 20), 16 * (1 << 20))))

    kernel = functools.partial(wgan_gp_kernel, c=C)

    def build(single_buffer_w1):
        if single_buffer_w1:
            # Constant index_map -> no need to double-buffer the resident weight.
            w1_spec = pl.BlockSpec((H, D), lambda i: (0, 0),
                                   pipeline_mode=pl.Buffered(1))
        else:
            w1_spec = pl.BlockSpec((H, D), lambda i: (0, 0))
        return pl.pallas_call(
            kernel,
            grid=(n_tiles,),
            in_specs=[
                pl.BlockSpec((TB, 1), lambda i: (i, 0)),   # alpha
                pl.BlockSpec((TB, D), lambda i: (i, 0)),   # x (flat, bf16)
                pl.BlockSpec((TB, D), lambda i: (i, 0)),   # Gz (flat, bf16)
                w1_spec,                                   # W1 (resident, bf16)
                pl.BlockSpec((1, H), lambda i: (0, 0)),    # b1
                pl.BlockSpec((1, H), lambda i: (0, 0)),    # w2
            ],
            # Per-tile partial outputs (no resident accumulator) -> the batch
            # grid axis is truly "parallel" (both TensorCores on v7x).
            out_specs=pl.BlockSpec((TB, L), lambda i: (i, 0)),
            out_shape=jax.ShapeDtypeStruct((B_pad, L), jnp.float32),
            compiler_params=pltpu.CompilerParams(
                dimension_semantics=("parallel",),
                vmem_limit_bytes=vmem_limit),
        )

    try:
        pen = build(True)(alpha2, x_f, gz_f, w1_bf, b1r, w2r)
    except Exception:
        # Fallback if this Pallas version rejects single-buffered inputs.
        pen = build(False)(alpha2, x_f, gz_f, w1_bf, b1r, w2r)

    # Tiny wrapper-side reduction; padded batch rows are dropped by the slice.
    return (float(lmbda) / float(B * L)) * jnp.sum(pen[:B])


if __name__ == "__main__":
    B, C, L, H = 2, 4, 16, 32
    D = C * L

    key = jax.random.PRNGKey(0)
    kx, kg, ka, kw1, kw2 = jax.random.split(key, 5)

    x = jax.random.normal(kx, (B, C, L), jnp.float32)
    gz = jax.random.normal(kg, (B, C, L), jnp.float32)
    alpha = jax.random.uniform(ka, (B, 1, 1), jnp.float32)   # torch.rand(bs,1,1)

    # deterministic critic parameters (linear -> tanh -> linear -> scalar)
    w1 = jax.random.normal(kw1, (H, D), jnp.float32) * (1.0 / jnp.sqrt(D))
    b1 = jnp.zeros((H,), jnp.float32)
    w2 = jax.random.normal(kw2, (H,), jnp.float32) * (1.0 / jnp.sqrt(H))

    gp = jax.block_until_ready(wgan_gp(x, gz, alpha, w1, b1, w2))

    # --- reference 1: numerics-matched (same bf16 streams / bf16 MXU inputs,
    #     f32 accumulation) -----------------------------------------------
    a2 = alpha.reshape(B, 1)
    xb = x.reshape(B, D).astype(jnp.bfloat16).astype(jnp.float32)
    gb = gz.reshape(B, D).astype(jnp.bfloat16).astype(jnp.float32)
    interp_f = gb + a2 * (xb - gb)
    w1_bf = w1.astype(jnp.bfloat16)
    h = lax.dot_general(interp_f.astype(jnp.bfloat16), w1_bf,
                        dimension_numbers=(((1,), (1,)), ((), ())),
                        preferred_element_type=jnp.float32) + b1[None, :]
    act = jnp.tanh(h)
    s = (1.0 - act * act) * w2[None, :]
    g3 = jnp.dot(s.astype(jnp.bfloat16), w1_bf,
                 preferred_element_type=jnp.float32).reshape(B, C, L)
    ref_match = LMBDA * jnp.mean((jnp.sqrt(jnp.sum(g3 * g3, axis=1)) - 1.0) ** 2)
    assert jnp.allclose(gp, ref_match, rtol=1e-3, atol=1e-3), (gp, ref_match)

    # --- reference 2: pure-f32 autograd through the critic (module semantics);
    #     looser tolerance because the kernel streams bf16 inputs and uses the
    #     MXU with bf16 operands. ------------------------------------------
    def disc_ref(z_flat):
        return jnp.tanh(z_flat @ w1.T + b1[None, :]) @ w2       # (B,)

    interp3 = alpha * x + (1.0 - alpha) * gz
    grads = jax.grad(lambda z: jnp.sum(disc_ref(z.reshape(B, -1))))(interp3)
    ref_f32 = LMBDA * jnp.mean((jnp.linalg.norm(grads, axis=1) - 1.0) ** 2)
    assert jnp.allclose(gp, ref_f32, rtol=5e-2, atol=5e-2), (gp, ref_f32)

    print("KERNEL_OK")
</pallas_src>

<mosaic_0001>
module attributes {stable_mosaic.version = 11 : i64} {
  func.func @wgan_gp_kernel(%arg0: i32, %arg1: memref<8x1xf32, #tpu.memory_space<vmem>>, %arg2: memref<8x64xbf16, #tpu.memory_space<vmem>>, %arg3: memref<8x64xbf16, #tpu.memory_space<vmem>>, %arg4: memref<32x64xbf16, #tpu.memory_space<vmem>>, %arg5: memref<1x32xf32, #tpu.memory_space<vmem>>, %arg6: memref<1x32xf32, #tpu.memory_space<vmem>>, %arg7: memref<8x16xf32, #tpu.memory_space<vmem>>) attributes {dimension_semantics = [#tpu.dimension_semantics<parallel>], iteration_bounds = array<i64: 1>, scalar_prefetch = 0 : i64, scratch_operands = 0 : i64, tpu.core_type = #tpu.core_type<tc>, window_params = [{transform_indices = @transform_0, window_bounds = array<i64: 8, 1>}, {transform_indices = @transform_1, window_bounds = array<i64: 8, 64>}, {transform_indices = @transform_2, window_bounds = array<i64: 8, 64>}, {pipeline_mode = #tpu.pipeline_mode<synchronous>, transform_indices = @transform_3, window_bounds = array<i64: 32, 64>}, {pipeline_mode = #tpu.pipeline_mode<synchronous>, transform_indices = @transform_4, window_bounds = array<i64: 1, 32>}, {pipeline_mode = #tpu.pipeline_mode<synchronous>, transform_indices = @transform_5, window_bounds = array<i64: 1, 32>}, {transform_indices = @transform_6, window_bounds = array<i64: 8, 16>}]} {
    %c0 = arith.constant 0 : index
    %c0_0 = arith.constant 0 : index
    %0 = vector.load %arg1[%c0, %c0_0] : memref<8x1xf32, #tpu.memory_space<vmem>>, vector<8x1xf32>
    %c0_1 = arith.constant 0 : index
    %c0_2 = arith.constant 0 : index
    %1 = vector.load %arg2[%c0_1, %c0_2] : memref<8x64xbf16, #tpu.memory_space<vmem>>, vector<8x64xbf16>
    %2 = arith.extf %1 : vector<8x64xbf16> to vector<8x64xf32>
    %c0_3 = arith.constant 0 : index
    %c0_4 = arith.constant 0 : index
    %3 = vector.load %arg3[%c0_3, %c0_4] : memref<8x64xbf16, #tpu.memory_space<vmem>>, vector<8x64xbf16>
    %4 = arith.extf %3 : vector<8x64xbf16> to vector<8x64xf32>
    %5 = arith.subf %2, %4 : vector<8x64xf32>
    %6 = vector.broadcast %0 : vector<8x1xf32> to vector<8x64xf32>
    %7 = arith.mulf %6, %5 : vector<8x64xf32>
    %8 = arith.addf %4, %7 : vector<8x64xf32>
    %c0_5 = arith.constant 0 : index
    %c0_6 = arith.constant 0 : index
    %9 = vector.load %arg4[%c0_5, %c0_6] : memref<32x64xbf16, #tpu.memory_space<vmem>>, vector<32x64xbf16>
    %10 = arith.truncf %8 : vector<8x64xf32> to vector<8x64xbf16>
    %cst = arith.constant dense<0.000000e+00> : vector<8x32xf32>
    %11 = tpu.matmul %10, %9, %cst {dimension_numbers = #tpu.dot_dimension_numbers<[1], [1], [0], [0], [0, 0, 1, 0], [], []>} : vector<8x64xbf16>, vector<32x64xbf16>, vector<8x32xf32> -> vector<8x32xf32>
    %c0_7 = arith.constant 0 : index
    %c0_8 = arith.constant 0 : index
    %12 = vector.load %arg5[%c0_7, %c0_8] : memref<1x32xf32, #tpu.memory_space<vmem>>, vector<1x32xf32>
    %13 = vector.broadcast %12 : vector<1x32xf32> to vector<8x32xf32>
    %14 = arith.addf %11, %13 : vector<8x32xf32>
    %15 = math.tanh %14 : vector<8x32xf32>
    %16 = arith.mulf %15, %15 : vector<8x32xf32>
    %cst_9 = arith.constant 1.000000e+00 : f32
    %17 = vector.broadcast %cst_9 : f32 to vector<8x32xf32>
    %18 = arith.subf %17, %16 : vector<8x32xf32>
    %c0_10 = arith.constant 0 : index
    %c0_11 = arith.constant 0 : index
    %19 = vector.load %arg6[%c0_10, %c0_11] : memref<1x32xf32, #tpu.memory_space<vmem>>, vector<1x32xf32>
    %20 = vector.broadcast %19 : vector<1x32xf32> to vector<8x32xf32>
    %21 = arith.mulf %18, %20 : vector<8x32xf32>
    %22 = arith.truncf %21 : vector<8x32xf32> to vector<8x32xbf16>
    %cst_12 = arith.constant dense<0.000000e+00> : vector<8x64xf32>
    %23 = tpu.matmul %22, %9, %cst_12 {dimension_numbers = #tpu.dot_dimension_numbers<[1], [0], [0], [1], [0, 0, 1, 1], [], []>} : vector<8x32xbf16>, vector<32x64xbf16>, vector<8x64xf32> -> vector<8x64xf32>
    %24 = arith.mulf %23, %23 : vector<8x64xf32>
    %25 = vector.extract_strided_slice %24 {offsets = [0, 0], sizes = [8, 16], strides = [1, 1]} : vector<8x64xf32> to vector<8x16xf32>
    %26 = vector.extract_strided_slice %24 {offsets = [0, 16], sizes = [8, 16], strides = [1, 1]} : vector<8x64xf32> to vector<8x16xf32>
    %27 = arith.addf %25, %26 : vector<8x16xf32>
    %28 = vector.extract_strided_slice %24 {offsets = [0, 32], sizes = [8, 16], strides = [1, 1]} : vector<8x64xf32> to vector<8x16xf32>
    %29 = arith.addf %27, %28 : vector<8x16xf32>
    %30 = vector.extract_strided_slice %24 {offsets = [0, 48], sizes = [8, 16], strides = [1, 1]} : vector<8x64xf32> to vector<8x16xf32>
    %31 = arith.addf %29, %30 : vector<8x16xf32>
    %32 = math.sqrt %31 : vector<8x16xf32>
    %cst_13 = arith.constant 1.000000e+00 : f32
    %33 = vector.broadcast %cst_13 : f32 to vector<8x16xf32>
    %34 = arith.subf %32, %33 : vector<8x16xf32>
    %35 = arith.mulf %34, %34 : vector<8x16xf32>
    %c0_14 = arith.constant 0 : index
    %c0_15 = arith.constant 0 : index
    %36 = vector.load %arg7[%c0_14, %c0_15] : memref<8x16xf32, #tpu.memory_space<vmem>>, vector<8x16xf32>
    tpu.vector_store %arg7[%c0_14, %c0_15], %35 {strides = array<i32>} : memref<8x16xf32, #tpu.memory_space<vmem>>, vector<8x16xf32>,
    return
  }
  func.func @transform_0(%arg0: i32) -> (i32, i32) {
    %c0_i32 = arith.constant 0 : i32
    %c0_i32_0 = arith.constant 0 : i32
    return %arg0, %c0_i32 : i32, i32
  }
  func.func @transform_1(%arg0: i32) -> (i32, i32) {
    %c0_i32 = arith.constant 0 : i32
    %c0_i32_0 = arith.constant 0 : i32
    return %arg0, %c0_i32 : i32, i32
  }
  func.func @transform_2(%arg0: i32) -> (i32, i32) {
    %c0_i32 = arith.constant 0 : i32
    %c0_i32_0 = arith.constant 0 : i32
    return %arg0, %c0_i32 : i32, i32
  }
  func.func @transform_3(%arg0: i32) -> (i32, i32) {
    %c0_i32 = arith.constant 0 : i32
    %c0_i32_0 = arith.constant 0 : i32
    %c0_i32_1 = arith.constant 0 : i32
    return %c0_i32, %c0_i32_0 : i32, i32
  }
  func.func @transform_4(%arg0: i32) -> (i32, i32) {
    %c0_i32 = arith.constant 0 : i32
    %c0_i32_0 = arith.constant 0 : i32
    %c0_i32_1 = arith.constant 0 : i32
    return %c0_i32, %c0_i32_0 : i32, i32
  }
  func.func @transform_5(%arg0: i32) -> (i32, i32) {
    %c0_i32 = arith.constant 0 : i32
    %c0_i32_0 = arith.constant 0 : i32
    %c0_i32_1 = arith.constant 0 : i32
    return %c0_i32, %c0_i32_0 : i32, i32
  }
  func.func @transform_6(%arg0: i32) -> (i32, i32) {
    %c0_i32 = arith.constant 0 : i32
    %c0_i32_0 = arith.constant 0 : i32
    return %arg0, %c0_i32 : i32, i32
  }
}

module attributes {stable_mosaic.version = 11 : i64} {
  func.func @wgan_gp_kernel(%arg0: i32, %arg1: memref<8x1xf32, #tpu.memory_space<vmem>>, %arg2: memref<8x64xbf16, #tpu.memory_space<vmem>>, %arg3: memref<8x64xbf16, #tpu.memory_space<vmem>>, %arg4: memref<32x64xbf16, #tpu.memory_space<vmem>>, %arg5: memref<1x32xf32, #tpu.memory_space<vmem>>, %arg6: memref<1x32xf32, #tpu.memory_space<vmem>>, %arg7: memref<8x16xf32, #tpu.memory_space<vmem>>) attributes {dimension_semantics = [#tpu.dimension_semantics<parallel>], iteration_bounds = array<i64: 1>, scalar_prefetch = 0 : i64, scratch_operands = 0 : i64, tpu.core_type = #tpu.core_type<tc>, window_params = [{transform_indices = @transform_0, window_bounds = array<i64: 8, 1>}, {transform_indices = @transform_1, window_bounds = array<i64: 8, 64>}, {transform_indices = @transform_2, window_bounds = array<i64: 8, 64>}, {pipeline_mode = #tpu.pipeline_mode<synchronous>, transform_indices = @transform_3, window_bounds = array<i64: 32, 64>}, {pipeline_mode = #tpu.pipeline_mode<synchronous>, transform_indices = @transform_4, window_bounds = array<i64: 1, 32>}, {pipeline_mode = #tpu.pipeline_mode<synchronous>, transform_indices = @transform_5, window_bounds = array<i64: 1, 32>}, {transform_indices = @transform_6, window_bounds = array<i64: 8, 16>}]} {
    %c0 = arith.constant 0 : index
    %c0_0 = arith.constant 0 : index
    %0 = vector.load %arg1[%c0, %c0_0] : memref<8x1xf32, #tpu.memory_space<vmem>>, vector<8x1xf32>
    %c0_1 = arith.constant 0 : index
    %c0_2 = arith.constant 0 : index
    %1 = vector.load %arg2[%c0_1, %c0_2] : memref<8x64xbf16, #tpu.memory_space<vmem>>, vector<8x64xbf16>
    %2 = arith.extf %1 : vector<8x64xbf16> to vector<8x64xf32>
    %c0_3 = arith.constant 0 : index
    %c0_4 = arith.constant 0 : index
    %3 = vector.load %arg3[%c0_3, %c0_4] : memref<8x64xbf16, #tpu.memory_space<vmem>>, vector<8x64xbf16>
    %4 = arith.extf %3 : vector<8x64xbf16> to vector<8x64xf32>
    %5 = arith.subf %2, %4 : vector<8x64xf32>
    %6 = vector.broadcast %0 : vector<8x1xf32> to vector<8x64xf32>
    %7 = arith.mulf %6, %5 : vector<8x64xf32>
    %8 = arith.addf %4, %7 : vector<8x64xf32>
    %c0_5 = arith.constant 0 : index
    %c0_6 = arith.constant 0 : index
    %9 = vector.load %arg4[%c0_5, %c0_6] : memref<32x64xbf16, #tpu.memory_space<vmem>>, vector<32x64xbf16>
    %10 = arith.truncf %8 : vector<8x64xf32> to vector<8x64xbf16>
    %cst = arith.constant dense<0.000000e+00> : vector<8x32xf32>
    %11 = tpu.matmul %10, %9, %cst {dimension_numbers = #tpu.dot_dimension_numbers<[1], [1], [0], [0], [0, 0, 1, 0], [], []>} : vector<8x64xbf16>, vector<32x64xbf16>, vector<8x32xf32> -> vector<8x32xf32>
    %c0_7 = arith.constant 0 : index
    %c0_8 = arith.constant 0 : index
    %12 = vector.load %arg5[%c0_7, %c0_8] : memref<1x32xf32, #tpu.memory_space<vmem>>, vector<1x32xf32>
    %13 = vector.broadcast %12 : vector<1x32xf32> to vector<8x32xf32>
    %14 = arith.addf %11, %13 : vector<8x32xf32>
    %15 = math.tanh %14 : vector<8x32xf32>
    %16 = arith.mulf %15, %15 : vector<8x32xf32>
    %cst_9 = arith.constant 1.000000e+00 : f32
    %17 = vector.broadcast %cst_9 : f32 to vector<8x32xf32>
    %18 = arith.subf %17, %16 : vector<8x32xf32>
    %c0_10 = arith.constant 0 : index
    %c0_11 = arith.constant 0 : index
    %19 = vector.load %arg6[%c0_10, %c0_11] : memref<1x32xf32, #tpu.memory_space<vmem>>, vector<1x32xf32>
    %20 = vector.broadcast %19 : vector<1x32xf32> to vector<8x32xf32>
    %21 = arith.mulf %18, %20 : vector<8x32xf32>
    %22 = arith.truncf %21 : vector<8x32xf32> to vector<8x32xbf16>
    %cst_12 = arith.constant dense<0.000000e+00> : vector<8x64xf32>
    %23 = tpu.matmul %22, %9, %cst_12 {dimension_numbers = #tpu.dot_dimension_numbers<[1], [0], [0], [1], [0, 0, 1, 1], [], []>} : vector<8x32xbf16>, vector<32x64xbf16>, vector<8x64xf32> -> vector<8x64xf32>
    %24 = arith.mulf %23, %23 : vector<8x64xf32>
    %25 = vector.extract_strided_slice %24 {offsets = [0, 0], sizes = [8, 16], strides = [1, 1]} : vector<8x64xf32> to vector<8x16xf32>
    %26 = vector.extract_strided_slice %24 {offsets = [0, 16], sizes = [8, 16], strides = [1, 1]} : vector<8x64xf32> to vector<8x16xf32>
    %27 = arith.addf %25, %26 : vector<8x16xf32>
    %28 = vector.extract_strided_slice %24 {offsets = [0, 32], sizes = [8, 16], strides = [1, 1]} : vector<8x64xf32> to vector<8x16xf32>
    %29 = arith.addf %27, %28 : vector<8x16xf32>
    %30 = vector.extract_strided_slice %24 {offsets = [0, 48], sizes = [8, 16], strides = [1, 1]} : vector<8x64xf32> to vector<8x16xf32>
    %31 = arith.addf %29, %30 : vector<8x16xf32>
    %32 = math.sqrt %31 : vector<8x16xf32>
    %cst_13 = arith.constant 1.000000e+00 : f32
    %33 = vector.broadcast %cst_13 : f32 to vector<8x16xf32>
    %34 = arith.subf %32, %33 : vector<8x16xf32>
    %35 = arith.mulf %34, %34 : vector<8x16xf32>
    %c0_14 = arith.constant 0 : index
    %c0_15 = arith.constant 0 : index
    %36 = vector.load %arg7[%c0_14, %c0_15] : memref<8x16xf32, #tpu.memory_space<vmem>>, vector<8x16xf32>
    tpu.vector_store %arg7[%c0_14, %c0_15], %35 {strides = array<i32>} : memref<8x16xf32, #tpu.memory_space<vmem>>, vector<8x16xf32>,
    return
  }
  func.func @transform_0(%arg0: i32) -> (i32, i32) {
    %c0_i32 = arith.constant 0 : i32
    %c0_i32_0 = arith.constant 0 : i32
    return %arg0, %c0_i32 : i32, i32
  }
  func.func @transform_1(%arg0: i32) -> (i32, i32) {
    %c0_i32 = arith.constant 0 : i32
    %c0_i32_0 = arith.constant 0 : i32
    return %arg0, %c0_i32 : i32, i32
  }
  func.func @transform_2(%arg0: i32) -> (i32, i32) {
    %c0_i32 = arith.constant 0 : i32
    %c0_i32_0 = arith.constant 0 : i32
    return %arg0, %c0_i32 : i32, i32
  }
  func.func @transform_3(%arg0: i32) -> (i32, i32) {
    %c0_i32 = arith.constant 0 : i32
    %c0_i32_0 = arith.constant 0 : i32
    %c0_i32_1 = arith.constant 0 : i32
    return %c0_i32, %c0_i32_0 : i32, i32
  }
  func.func @transform_4(%arg0: i32) -> (i32, i32) {
    %c0_i32 = arith.constant 0 : i32
    %c0_i32_0 = arith.constant 0 : i32
    %c0_i32_1 = arith.constant 0 : i32
    return %c0_i32, %c0_i32_0 : i32, i32
  }
  func.func @transform_5(%arg0: i32) -> (i32, i32) {
    %c0_i32 = arith.constant 0 : i32
    %c0_i32_0 = arith.constant 0 : i32
    %c0_i32_1 = arith.constant 0 : i32
    return %c0_i32, %c0_i32_0 : i32, i32
  }
  func.func @transform_6(%arg0: i32) -> (i32, i32) {
    %c0_i32 = arith.constant 0 : i32
    %c0_i32_0 = arith.constant 0 : i32
    return %arg0, %c0_i32 : i32, i32
  }
}

</mosaic_0001>

<bundles_post_ra>
// kernel: tpu_custom_call.1
= control target key start
LH: loop header
LB: loop body
LE: loop exit
PB: predicated region body
PF: predicated region fallthrough
CT: control target
= control target key end

     0   :  { %11 = vsyncpa [#allocation3], 0  ;;  %s400_s0 = inlined_call_operand.vmem [shape: f32[8,1], index: 0, kind: input, shape index: {}]   ;;  %s401_s1 = inlined_call_operand.vmem [shape: bf16[8,64], index: 1, kind: input, shape index: {}]   ;;  %s402_s2 = inlined_call_operand.hbm [shape: bf16[8,64], index: 2, kind: input, shape index: {}]   ;;  %s403_s3 = inlined_call_operand.vmem [shape: bf16[32,64], index: 3, kind: input, shape index: {}]   ;;  %s404_s4 = inlined_call_operand.vmem [shape: f32[1,32], index: 4, kind: input, shape index: {}]   ;;  %s405_s5 = inlined_call_operand.vmem [shape: f32[1,32], index: 5, kind: input, shape index: {}]   ;;  %s406_s6 = inlined_call_operand.hbm [shape: f32[8,16], index: 6, kind: output, shape index: {}]  }
   0x1   :  { %12 = vsyncpa [#allocation4], 0  ;;  %s312_s21 = smov [#allocation2]   ;;  %s264_s25 = scalar_lea.hbm %s402_s2, 64 }
   0x2   :  { %s23_s22 = sshll.u32 %s312_s21, 4  ;;  %p265_p0 = scmp.ne.s32.totalorder %s402_s2, %s264_s25  ;;  %s24_s22 = int_to_ptr.vmem [resolvable:$true] %s23_s22 }
   0x3   :  { %p268_p1 = scmp.lt.u32.totalorder %s264_s25, %s402_s2 }
   0x5   :  { %p270_p2 = pnand %p268_p1, %p265_p0 }
   0x7   :  { %273 = shalt.err (!%p270_p2)
}
   0x8   :  { %s274_s30 = scalar_lea.vmem %s24_s22, 64  ;;  %p279_p4 = scmp.lt.s32.totalorder %s24_s22, %s24_s22 }
   0x9   :  { %p275_p3 = scmp.ne.s32.totalorder %s24_s22, %s274_s30  ;;  %p280_p5 = scmp.lt.s32.totalorder %s274_s30, %s274_s30 }
   0xb   :  { %p281_p6 = por %p280_p5, %p279_p4 }
   0xd   :  { %p282_p7 = pnand %p281_p6, %p275_p3 }
   0xf   :  { %285 = shalt.err (!%p282_p7)
}
  0x10   :  { %26 = dma.hbm_to_vmem [thread:$0]  %s402_s2, 64, %s24_s22, [#allocation3]  }
  0x11   :  { %308 = dma.done.wait [#allocation3], 64  }
  0x12   :  { %309 = vsyncadd [#allocation3], 4294967232  ;;  %v313_v0 = vmov 0   ;;  %v314_v1 = vmov 0.0   ;;  %v37_v2 = vld [vmem:[%s400_s0] sm:$0xff]  ;;  %vm72_vm0 = vcmask 523264  }
  0x13   :  { %257 = vset.pattern.permute.xlu0 %v313_v0  ;;  %233 = vmatprep.subr.bf16.mxu0 %v314_v1  ;;  %v258_v3 = vld [vmem:[%s403_s3] sm:$0xff]   ;;  %v259_v5 = vld [vmem:[%s403_s3 + $0x8] sm:$0xff]   ;;  %vm315_vm1 = vmmov 0   ;;  %v40_v8 = vld [vmem:[#allocation2] sm:$0xf]  ;;  %vm136_vm2 = vcmask 261120  }
  0x14   :  { %241 = vmatprep.subr.bf16.mxu1 %v314_v1  ;;  %45 = vperm.xlu0 %257, %v37_v2   ;;  %v77_v4 = vsel %vm72_vm0, %v258_v3, 0  ;;  %v80_v6 = vsel %vm72_vm0, %v259_v5, 0  ;;  %v38_v7 = vld [vmem:[%s401_s1] sm:$0xf]  ;;  %v41_v10 = vunpack.c.l.bf16 %v40_v8  ;;  %s317_s17 = smov 112   ;;  %s318_s18 = smov 80  }
  0x15   :  { %242 = vmatpush3.bf16.msra.mxu1 %v258_v3  ;;  %234 = vmatpush3.bf16.xpose.msra.mxu0 %v77_v4  ;;  %v39_v9 = vunpack.c.l.bf16 %v38_v7  ;;  %v220_v16 = vld [vmem:[%s404_s4] ss:$0 sm:$0xff]  ;;  %s316_s4 = smov 96   ;;  %vm203_vm5 = vcmask 130048  }
  0x16   :  { %243 = vmatprep.subr.bf16.mxu1 %v314_v1  ;;  %235 = vmatprep.subr.bf16.mxu0 %v314_v1  ;;  %v224_v24 = vld [vmem:[%s405_s5] ss:$0 sm:$0xff]  ;;  %s319_s5 = smov [#allocation5]  }
  0x17   :  { %237 = vmatprep.mubr.msk.bf16.mxu0 %vm315_vm1, %v314_v1  ;;  %245 = vmatprep.mubr.msk.bf16.mxu1 %vm315_vm1, %v314_v1  ;;  %v42_v11 = vsub.f32 %v39_v9, %v41_v10  ;;  %s211_s19 = sshll.u32 %s319_s5, 4  ;;  %s212_s19 = int_to_ptr.vmem [resolvable:$true] %s211_s19 }
  0x18   :  { %s286_s20 = scalar_lea.vmem %s212_s19, 128  ;;  %p291_p9 = scmp.lt.s32.totalorder %s212_s19, %s212_s19 }
  0x19   :  { %244 = vmatpush3.bf16.msra.mxu1 %v259_v5  ;;  %p287_p8 = scmp.ne.s32.totalorder %s212_s19, %s286_s20  ;;  %p292_p10 = scmp.lt.s32.totalorder %s286_s20, %s286_s20 }
  0x1b   :  { %p293_p11 = por %p292_p10, %p291_p9 }
  0x1d   :  { %236 = vmatpush3.bf16.xpose.msra.mxu0 %v80_v6  ;;  %p294_p12 = pnand %p293_p11, %p287_p8 }
  0x93   :  { %v46_v12 = vpop.permute.xlu0 %45 }
  0x94   :  { %v48_v13 = vmul.f32 %v46_v12, %v42_v11 }
  0x96   :  { %v49_v14 = vadd.f32 %v48_v13, %v41_v10 }
  0x98   :  { %v54_v15 = vpack.c.bf16 %v49_v14, %v49_v14 }
  0x9a   :  { %238 = vmatmul.mubr.msk.bf16.vlgmr.msra.gmra.mrb[0].mxu0 %vm72_vm0, %v54_v15 }
 0x16d   :  { %v116_v17 = vpop.f32.mrb[0].mxu0 }
 0x16e   :  { %v117_v18 = vadd.f32 %v220_v16, %v116_v17  ;;  %v239_v19 = vpop.f32.mrb[1].mxu0 }
 0x16f   :  { %v119_v20 = vpop.f32.mrb[2].mxu0 }
 0x170   :  { %260 = vtanh.f32 %v117_v18  ;;  %v240_v21 = vpop.f32.mrb[3].mxu0 }
 0x17a   :  { %v261_v22 = vpop.eup %260 }
 0x17b   :  { %v123_v23 = vmul.f32 %v261_v22, %v261_v22 }
 0x17d   :  { %v124_v25 = vsub.f32 1.0, %v123_v23 }
 0x17f   :  { %v132_v26 = vmul.f32 %v224_v24, %v124_v25 }
 0x181   :  { %v133_v27 = vpack.c.bf16 %v132_v26, %v132_v26 }
 0x183   :  { %246 = vmatmul.mubr.msk.bf16.vlgmr.msra.gmra.mrb[0].mxu1 %vm136_vm2, %v133_v27 }
 0x256   :  { %v174_v28 = vpop.f32.mrb[0].mxu1 }
 0x257   :  { %v180_v29 = vmul.f32 %v174_v28, %v174_v28  ;;  %v247_v30 = vpop.f32.mrb[1].mxu1 }
 0x258   :  { %v177_v31 = vpop.f32.mrb[2].mxu1 }
 0x259   :  { %186 = vrot.lane.b32.xlu1 %v180_v29, %s316_s4  ;;  %182 = vrot.lane.b32.xlu0 %v180_v29, %s317_s17  ;;  %v248_v32 = vpop.f32.mrb[3].mxu1 }
 0x25d   :  { %190 = vrot.lane.b32.xlu1 %v180_v29, %s318_s18 }
 0x2cb   :  { %v187_v33 = vpop.permute.xlu1 %186  ;;  %v183_v34 = vpop.permute.xlu0 %182 }
 0x2cc   :  { %v185_v35 = vadd.f32 %v183_v34, %v180_v29 }
 0x2ce   :  { %v189_v36 = vadd.f32 %v187_v33, %v185_v35 }
 0x2cf   :  { %v191_v37 = vpop.permute.xlu1 %190 }
 0x2d0   :  { %v193_v38 = vadd.f32 %v191_v37, %v189_v36 }
 0x2d2   :  { %262 = vrsqrt.f32 %v193_v38  ;;  %vm196_vm3 = vcmp.eq.f32.partialorder %v193_v38, inf  ;;  %v199_v41 = vand.u32 2147483648, %v193_v38  ;;  %vm198_vm4 = vcmp.eq.f32.partialorder %v193_v38, 0.0 }
 0x2dc   :  { %v263_v39 = vpop.eup %262 }
 0x2dd   :  { %v195_v40 = vmul.f32 %v263_v39, %v193_v38 }
 0x2df   :  { %v197_v42 = vsel %vm196_vm3, %v193_v38, %v195_v40 }
 0x2e0   :  { %v200_v43 = vsel %vm198_vm4, %v199_v41, %v197_v42 }
 0x2e1   :  { %v226_v44 = vadd.f32 -1.0, %v200_v43 }
 0x2e3   :  { %v202_v45 = vmul.f32 %v226_v44, %v226_v44 }
 0x2e5   :  { %204 = vst.msk [vmem:[#allocation5] sm:$0xff] %vm203_vm5, %v202_v45 }
 0x2e6   :  { %297 = shalt.err (!%p294_p12)
}
 0x2e7   :  { %s298_s23 = scalar_lea.hbm %s406_s6, 128 }
 0x2e8   :  { %p299_p13 = scmp.ne.s32.totalorder %s406_s6, %s298_s23  ;;  %p302_p0 = scmp.lt.u32.totalorder %s298_s23, %s406_s6 }
 0x2ea   :  { %p304_p1 = pnand %p302_p0, %p299_p13 }
 0x2ec   :  { %307 = shalt.err (!%p304_p1)
}
 0x2ed   :  { %214 = dma.vmem_to_hbm [thread:$0]  %s212_s19, 128, %s406_s6, [#allocation4]  }
 0x2ee   :  { %310 = dma.done.wait [#allocation4], 128  }
 0x2ef   :  { %311 = vsyncadd [#allocation4], 4294967168 }
 0x2f0   :  { %218 = vsyncpa [#allocation3], 1 }
 0x2f1   :  { %219 = vsyncpa [#allocation4], 1 }

// kernel: tpu_custom_call.1
= control target key start
LH: loop header
LB: loop body
LE: loop exit
PB: predicated region body
PF: predicated region fallthrough
CT: control target
= control target key end

     0   :  { %11 = vsyncpa [#allocation3], 0  ;;  %s400_s0 = inlined_call_operand.vmem [shape: f32[8,1], index: 0, kind: input, shape index: {}]   ;;  %s401_s1 = inlined_call_operand.vmem [shape: bf16[8,64], index: 1, kind: input, shape index: {}]   ;;  %s402_s2 = inlined_call_operand.hbm [shape: bf16[8,64], index: 2, kind: input, shape index: {}]   ;;  %s403_s3 = inlined_call_operand.vmem [shape: bf16[32,64], index: 3, kind: input, shape index: {}]   ;;  %s404_s4 = inlined_call_operand.vmem [shape: f32[1,32], index: 4, kind: input, shape index: {}]   ;;  %s405_s5 = inlined_call_operand.vmem [shape: f32[1,32], index: 5, kind: input, shape index: {}]   ;;  %s406_s6 = inlined_call_operand.hbm [shape: f32[8,16], index: 6, kind: output, shape index: {}]  }
   0x1   :  { %12 = vsyncpa [#allocation4], 0  ;;  %s312_s21 = smov [#allocation2]   ;;  %s264_s25 = scalar_lea.hbm %s402_s2, 64 }
   0x2   :  { %s23_s22 = sshll.u32 %s312_s21, 4  ;;  %p265_p0 = scmp.ne.s32.totalorder %s402_s2, %s264_s25  ;;  %s24_s22 = int_to_ptr.vmem [resolvable:$true] %s23_s22 }
   0x3   :  { %p268_p1 = scmp.lt.u32.totalorder %s264_s25, %s402_s2 }
   0x5   :  { %p270_p2 = pnand %p268_p1, %p265_p0 }
   0x7   :  { %273 = shalt.err (!%p270_p2)
}
   0x8   :  { %s274_s30 = scalar_lea.vmem %s24_s22, 64  ;;  %p279_p4 = scmp.lt.s32.totalorder %s24_s22, %s24_s22 }
   0x9   :  { %p275_p3 = scmp.ne.s32.totalorder %s24_s22, %s274_s30  ;;  %p280_p5 = scmp.lt.s32.totalorder %s274_s30, %s274_s30 }
   0xb   :  { %p281_p6 = por %p280_p5, %p279_p4 }
   0xd   :  { %p282_p7 = pnand %p281_p6, %p275_p3 }
   0xf   :  { %285 = shalt.err (!%p282_p7)
}
  0x10   :  { %26 = dma.hbm_to_vmem [thread:$0]  %s402_s2, 64, %s24_s22, [#allocation3]  }
  0x11   :  { %308 = dma.done.wait [#allocation3], 64  }
  0x12   :  { %309 = vsyncadd [#allocation3], 4294967232  ;;  %v313_v0 = vmov 0   ;;  %v314_v1 = vmov 0.0   ;;  %v37_v2 = vld [vmem:[%s400_s0] sm:$0xff]  ;;  %vm72_vm0 = vcmask 523264  }
  0x13   :  { %257 = vset.pattern.permute.xlu0 %v313_v0  ;;  %233 = vmatprep.subr.bf16.mxu0 %v314_v1  ;;  %v258_v3 = vld [vmem:[%s403_s3] sm:$0xff]   ;;  %v259_v5 = vld [vmem:[%s403_s3 + $0x8] sm:$0xff]   ;;  %vm315_vm1 = vmmov 0   ;;  %v40_v8 = vld [vmem:[#allocation2] sm:$0xf]  ;;  %vm136_vm2 = vcmask 261120  }
  0x14   :  { %241 = vmatprep.subr.bf16.mxu1 %v314_v1  ;;  %45 = vperm.xlu0 %257, %v37_v2   ;;  %v77_v4 = vsel %vm72_vm0, %v258_v3, 0  ;;  %v80_v6 = vsel %vm72_vm0, %v259_v5, 0  ;;  %v38_v7 = vld [vmem:[%s401_s1] sm:$0xf]  ;;  %v41_v10 = vunpack.c.l.bf16 %v40_v8  ;;  %s317_s17 = smov 112   ;;  %s318_s18 = smov 80  }
  0x15   :  { %242 = vmatpush3.bf16.msra.mxu1 %v258_v3  ;;  %234 = vmatpush3.bf16.xpose.msra.mxu0 %v77_v4  ;;  %v39_v9 = vunpack.c.l.bf16 %v38_v7  ;;  %v220_v16 = vld [vmem:[%s404_s4] ss:$0 sm:$0xff]  ;;  %s316_s4 = smov 96   ;;  %vm203_vm5 = vcmask 130048  }
  0x16   :  { %243 = vmatprep.subr.bf16.mxu1 %v314_v1  ;;  %235 = vmatprep.subr.bf16.mxu0 %v314_v1  ;;  %v224_v24 = vld [vmem:[%s405_s5] ss:$0 sm:$0xff]  ;;  %s319_s5 = smov [#allocation5]  }
  0x17   :  { %237 = vmatprep.mubr.msk.bf16.mxu0 %vm315_vm1, %v314_v1  ;;  %245 = vmatprep.mubr.msk.bf16.mxu1 %vm315_vm1, %v314_v1  ;;  %v42_v11 = vsub.f32 %v39_v9, %v41_v10  ;;  %s211_s19 = sshll.u32 %s319_s5, 4  ;;  %s212_s19 = int_to_ptr.vmem [resolvable:$true] %s211_s19 }
  0x18   :  { %s286_s20 = scalar_lea.vmem %s212_s19, 128  ;;  %p291_p9 = scmp.lt.s32.totalorder %s212_s19, %s212_s19 }
  0x19   :  { %244 = vmatpush3.bf16.msra.mxu1 %v259_v5  ;;  %p287_p8 = scmp.ne.s32.totalorder %s212_s19, %s286_s20  ;;  %p292_p10 = scmp.lt.s32.totalorder %s286_s20, %s286_s20 }
  0x1b   :  { %p293_p11 = por %p292_p10, %p291_p9 }
  0x1d   :  { %236 = vmatpush3.bf16.xpose.msra.mxu0 %v80_v6  ;;  %p294_p12 = pnand %p293_p11, %p287_p8 }
  0x93   :  { %v46_v12 = vpop.permute.xlu0 %45 }
  0x94   :  { %v48_v13 = vmul.f32 %v46_v12, %v42_v11 }
  0x96   :  { %v49_v14 = vadd.f32 %v48_v13, %v41_v10 }
  0x98   :  { %v54_v15 = vpack.c.bf16 %v49_v14, %v49_v14 }
  0x9a   :  { %238 = vmatmul.mubr.msk.bf16.vlgmr.msra.gmra.mrb[0].mxu0 %vm72_vm0, %v54_v15 }
 0x16d   :  { %v116_v17 = vpop.f32.mrb[0].mxu0 }
 0x16e   :  { %v117_v18 = vadd.f32 %v220_v16, %v116_v17  ;;  %v239_v19 = vpop.f32.mrb[1].mxu0 }
 0x16f   :  { %v119_v20 = vpop.f32.mrb[2].mxu0 }
 0x170   :  { %260 = vtanh.f32 %v117_v18  ;;  %v240_v21 = vpop.f32.mrb[3].mxu0 }
 0x17a   :  { %v261_v22 = vpop.eup %260 }
 0x17b   :  { %v123_v23 = vmul.f32 %v261_v22, %v261_v22 }
 0x17d   :  { %v124_v25 = vsub.f32 1.0, %v123_v23 }
 0x17f   :  { %v132_v26 = vmul.f32 %v224_v24, %v124_v25 }
 0x181   :  { %v133_v27 = vpack.c.bf16 %v132_v26, %v132_v26 }
 0x183   :  { %246 = vmatmul.mubr.msk.bf16.vlgmr.msra.gmra.mrb[0].mxu1 %vm136_vm2, %v133_v27 }
 0x256   :  { %v174_v28 = vpop.f32.mrb[0].mxu1 }
 0x257   :  { %v180_v29 = vmul.f32 %v174_v28, %v174_v28  ;;  %v247_v30 = vpop.f32.mrb[1].mxu1 }
 0x258   :  { %v177_v31 = vpop.f32.mrb[2].mxu1 }
 0x259   :  { %186 = vrot.lane.b32.xlu1 %v180_v29, %s316_s4  ;;  %182 = vrot.lane.b32.xlu0 %v180_v29, %s317_s17  ;;  %v248_v32 = vpop.f32.mrb[3].mxu1 }
 0x25d   :  { %190 = vrot.lane.b32.xlu1 %v180_v29, %s318_s18 }
 0x2cb   :  { %v187_v33 = vpop.permute.xlu1 %186  ;;  %v183_v34 = vpop.permute.xlu0 %182 }
 0x2cc   :  { %v185_v35 = vadd.f32 %v183_v34, %v180_v29 }
 0x2ce   :  { %v189_v36 = vadd.f32 %v187_v33, %v185_v35 }
 0x2cf   :  { %v191_v37 = vpop.permute.xlu1 %190 }
 0x2d0   :  { %v193_v38 = vadd.f32 %v191_v37, %v189_v36 }
 0x2d2   :  { %262 = vrsqrt.f32 %v193_v38  ;;  %vm196_vm3 = vcmp.eq.f32.partialorder %v193_v38, inf  ;;  %v199_v41 = vand.u32 2147483648, %v193_v38  ;;  %vm198_vm4 = vcmp.eq.f32.partialorder %v193_v38, 0.0 }
 0x2dc   :  { %v263_v39 = vpop.eup %262 }
 0x2dd   :  { %v195_v40 = vmul.f32 %v263_v39, %v193_v38 }
 0x2df   :  { %v197_v42 = vsel %vm196_vm3, %v193_v38, %v195_v40 }
 0x2e0   :  { %v200_v43 = vsel %vm198_vm4, %v199_v41, %v197_v42 }
 0x2e1   :  { %v226_v44 = vadd.f32 -1.0, %v200_v43 }
 0x2e3   :  { %v202_v45 = vmul.f32 %v226_v44, %v226_v44 }
 0x2e5   :  { %204 = vst.msk [vmem:[#allocation5] sm:$0xff] %vm203_vm5, %v202_v45 }
 0x2e6   :  { %297 = shalt.err (!%p294_p12)
}
 0x2e7   :  { %s298_s23 = scalar_lea.hbm %s406_s6, 128 }
 0x2e8   :  { %p299_p13 = scmp.ne.s32.totalorder %s406_s6, %s298_s23  ;;  %p302_p0 = scmp.lt.u32.totalorder %s298_s23, %s406_s6 }
 0x2ea   :  { %p304_p1 = pnand %p302_p0, %p299_p13 }
 0x2ec   :  { %307 = shalt.err (!%p304_p1)
}
 0x2ed   :  { %214 = dma.vmem_to_hbm [thread:$0]  %s212_s19, 128, %s406_s6, [#allocation4]  }
 0x2ee   :  { %310 = dma.done.wait [#allocation4], 128  }
 0x2ef   :  { %311 = vsyncadd [#allocation4], 4294967168 }
 0x2f0   :  { %218 = vsyncpa [#allocation3], 1 }
 0x2f1   :  { %219 = vsyncpa [#allocation4], 1 }

</bundles_post_ra>
